<compile_context>
chip_gen: v5e
topology: v5e:2x2
jax: 0.10.0
libtpu: 0.0.40
codegen_flags: <defaults>
</compile_context>

<pallas_src>
import jax
import jax.numpy as jnp
from jax import lax
from jax.experimental import pallas as pl
from jax.experimental.pallas import tpu as pltpu


def _linear_kernel(x_ref, w_ref, b_ref, o_ref):
    # x_ref: (bm, K) bf16, w_ref: (N, K) bf16, b_ref: (1, N) f32, o_ref: (bm, N) f32
    # y[b, n] = sum_k x[b, k] * w[n, k]   (transposed-RHS contraction on the MXU,
    # f32 accumulation; bias add stays in f32 so the VPU path is clean on v5e).
    acc = lax.dot_general(
        x_ref[...],
        w_ref[...],
        dimension_numbers=(((1,), (1,)), ((), ())),
        preferred_element_type=jnp.float32,
    )
    o_ref[...] = acc + b_ref[...]


def boris_net_forward(x, weight, bias, *, bm_max=512):
    """x: (B, C, H, W) float32; weight: (10, 4096) f32; bias: (10,) f32 -> (B, 10) f32."""
    B = x.shape[0]
    x_flat = x.reshape(B, -1)                  # (B, 4096), row-major like torch.view
    K = x_flat.shape[1]
    N = weight.shape[0]

    # bf16 operands for the MXU; accumulation / epilogue / output remain f32.
    x_bf = x_flat.astype(jnp.bfloat16)
    w_bf = weight.astype(jnp.bfloat16)
    b2d = bias.reshape(1, N).astype(jnp.float32)

    # Batch tile: whole batch in one step when small, 512-row tiles otherwise
    # (sized for v7x's 32 MiB scoped VMEM with double-buffered x blocks).
    bm = B if B <= bm_max else bm_max
    grid = (pl.cdiv(B, bm),)

    cost = pl.CostEstimate(
        flops=2 * B * K * N,
        transcendentals=0,
        bytes_accessed=2 * (B * K + N * K) + 4 * (N + B * N),
    )

    return pl.pallas_call(
        _linear_kernel,
        out_shape=jax.ShapeDtypeStruct((B, N), jnp.float32),
        grid=grid,
        in_specs=[
            pl.BlockSpec((bm, K), lambda i: (i, 0)),   # x streams per batch tile
            pl.BlockSpec((N, K), lambda i: (0, 0)),    # weight DMA'd once, VMEM-resident
            pl.BlockSpec((1, N), lambda i: (0, 0)),    # bias resident
        ],
        out_specs=pl.BlockSpec((bm, N), lambda i: (i, 0)),
        compiler_params=pltpu.CompilerParams(
            dimension_semantics=("parallel",),         # shards B across TCs on v7x
        ),
        cost_estimate=cost,
    )(x_bf, w_bf, b2d)


if __name__ == "__main__":
    key = jax.random.PRNGKey(0)
    kx, kw, kb = jax.random.split(key, 3)

    # Input consistent with Linear(4096, 10): flattened feature dim must be 4096.
    B, C, H, W = 2, 4, 32, 32                  # 4 * 32 * 32 = 4096
    x = jax.random.normal(kx, (B, C, H, W), dtype=jnp.float32)

    # Deterministic synthetic parameters (shapes from nn.Linear(4096, 10)).
    in_features, out_features = 4096, 10
    bound = 1.0 / (in_features ** 0.5)
    weight = jax.random.uniform(
        kw, (out_features, in_features), dtype=jnp.float32,
        minval=-bound, maxval=bound)
    bias = jax.random.uniform(
        kb, (out_features,), dtype=jnp.float32, minval=-bound, maxval=bound)

    y = boris_net_forward(x, weight, bias)
    y = jax.block_until_ready(y)

    # Reference: same bf16-rounded inputs, f32 accumulation (what the kernel computes).
    x_flat = x.reshape(B, -1)
    x_bf = x_flat.astype(jnp.bfloat16).astype(jnp.float32)
    w_bf = weight.astype(jnp.bfloat16).astype(jnp.float32)
    y_ref = x_bf @ w_bf.T + bias

    assert y.shape == (B, out_features)
    assert y.dtype == jnp.float32
    assert jnp.allclose(y, y_ref, atol=1e-2, rtol=1e-2)

    print("KERNEL_OK")
</pallas_src>

<mosaic_0001>
module attributes {stable_mosaic.version = 11 : i64} {
  func.func @_linear_kernel(%arg0: i32, %arg1: memref<2x4096xbf16, #tpu.memory_space<vmem>>, %arg2: memref<10x4096xbf16, #tpu.memory_space<vmem>>, %arg3: memref<1x10xf32, #tpu.memory_space<vmem>>, %arg4: memref<2x10xf32, #tpu.memory_space<vmem>>) attributes {dimension_semantics = [#tpu.dimension_semantics<parallel>], iteration_bounds = array<i64: 1>, scalar_prefetch = 0 : i64, scratch_operands = 0 : i64, tpu.core_type = #tpu.core_type<tc>, window_params = [{transform_indices = @transform_0, window_bounds = array<i64: 2, 4096>}, {pipeline_mode = #tpu.pipeline_mode<synchronous>, transform_indices = @transform_1, window_bounds = array<i64: 10, 4096>}, {pipeline_mode = #tpu.pipeline_mode<synchronous>, transform_indices = @transform_2, window_bounds = array<i64: 1, 10>}, {transform_indices = @transform_3, window_bounds = array<i64: 2, 10>}]} {
    %c0 = arith.constant 0 : index
    %c0_0 = arith.constant 0 : index
    %0 = vector.load %arg1[%c0, %c0_0] : memref<2x4096xbf16, #tpu.memory_space<vmem>>, vector<2x4096xbf16>
    %c0_1 = arith.constant 0 : index
    %c0_2 = arith.constant 0 : index
    %1 = vector.load %arg2[%c0_1, %c0_2] : memref<10x4096xbf16, #tpu.memory_space<vmem>>, vector<10x4096xbf16>
    %cst = arith.constant dense<0.000000e+00> : vector<2x10xf32>
    %2 = tpu.matmul %0, %1, %cst {dimension_numbers = #tpu.dot_dimension_numbers<[1], [1], [0], [0], [0, 0, 1, 0], [], []>} : vector<2x4096xbf16>, vector<10x4096xbf16>, vector<2x10xf32> -> vector<2x10xf32>
    %c0_3 = arith.constant 0 : index
    %c0_4 = arith.constant 0 : index
    %3 = vector.load %arg3[%c0_3, %c0_4] : memref<1x10xf32, #tpu.memory_space<vmem>>, vector<1x10xf32>
    %4 = vector.broadcast %3 : vector<1x10xf32> to vector<2x10xf32>
    %5 = arith.addf %2, %4 : vector<2x10xf32>
    %c0_5 = arith.constant 0 : index
    %c0_6 = arith.constant 0 : index
    %6 = vector.load %arg4[%c0_5, %c0_6] : memref<2x10xf32, #tpu.memory_space<vmem>>, vector<2x10xf32>
    tpu.vector_store %arg4[%c0_5, %c0_6], %5 {strides = array<i32>} : memref<2x10xf32, #tpu.memory_space<vmem>>, vector<2x10xf32>,
    return
  }
  func.func @transform_0(%arg0: i32) -> (i32, i32) {
    %c0_i32 = arith.constant 0 : i32
    %c0_i32_0 = arith.constant 0 : i32
    return %arg0, %c0_i32 : i32, i32
  }
  func.func @transform_1(%arg0: i32) -> (i32, i32) {
    %c0_i32 = arith.constant 0 : i32
    %c0_i32_0 = arith.constant 0 : i32
    %c0_i32_1 = arith.constant 0 : i32
    return %c0_i32, %c0_i32_0 : i32, i32
  }
  func.func @transform_2(%arg0: i32) -> (i32, i32) {
    %c0_i32 = arith.constant 0 : i32
    %c0_i32_0 = arith.constant 0 : i32
    %c0_i32_1 = arith.constant 0 : i32
    return %c0_i32, %c0_i32_0 : i32, i32
  }
  func.func @transform_3(%arg0: i32) -> (i32, i32) {
    %c0_i32 = arith.constant 0 : i32
    %c0_i32_0 = arith.constant 0 : i32
    return %arg0, %c0_i32 : i32, i32
  }
}

</mosaic_0001>

<bundles_post_ra>
// kernel: tpu_custom_call.1
= control target key start
LH: loop header
LB: loop body
LE: loop exit
PB: predicated region body
PF: predicated region fallthrough
CT: control target
= control target key end

     0   :  { %8 = vsyncpa [#allocation3], 0  ;;  %s1035_s0 = inlined_call_operand.hbm [shape: bf16[2,4096], index: 0, kind: input, shape index: {}]   ;;  %s1036_s1 = inlined_call_operand.hbm [shape: bf16[10,4096], index: 1, kind: input, shape index: {}]   ;;  %s1037_s2 = inlined_call_operand.vmem [shape: f32[1,10], index: 2, kind: input, shape index: {}]   ;;  %s1038_s3 = inlined_call_operand.hbm [shape: f32[2,10], index: 3, kind: output, shape index: {}]  }
   0x1   :  { %9 = vsyncpa [#allocation6], 0 }
   0x2   :  { %10 = vsyncpa [#allocation4], 0  ;;  %s16_s14 = sshll.u32 %s1035_s0, 4  ;;  %s998_s15 = smov [#allocation2]   ;;  %s17_s14 = int_to_ptr.hbm [resolvable:$true] %s16_s14 }
   0x3   :  { %s18_s16 = sshll.u32 %s998_s15, 4  ;;  %s26_s19 = sshll.u32 %s1036_s1, 4  ;;  %s19_s16 = int_to_ptr.vmem [resolvable:$true] %s18_s16  ;;  %s27_s19 = int_to_ptr.hbm [resolvable:$true] %s26_s19 }
   0x4   :  { %21 = dma.hbm_to_vmem [thread:$0]  %s17_s14, 512, %s19_s16, [#allocation3]  }
   0x5   :  { %s999_s20 = smov [#allocation5]   ;;  %s1000_s22 = smov 2048  }
   0x6   :  { %s28_s21 = sshll.u32 %s999_s20, 4  ;;  %s1001_s23 = smov 128   ;;  %s29_s21 = int_to_ptr.vmem [resolvable:$true] %s28_s21 }
   0x7   :  { %34 = dma.hbm_to_vmem [thread:$0]  %s27_s19, 4096, %s29_s21, [#allocation6], %s1000_s22, %s1000_s22, %s1001_s23  }
   0x8   :  { %992 = dma.done.wait [#allocation3], 512  }
   0x9   :  { %993 = vsyncadd [#allocation3], 4294966784 }
   0xa   :  { %994 = dma.done.wait [#allocation6], 4096  }
   0xb   :  { %995 = vsyncadd [#allocation6], 4294963200  ;;  %v756_v0 = vld [vmem:[#allocation5] sm:$0xf]  ;;  %v882_v2 = vld [vmem:[#allocation5 + $0x4] sm:$0xf] }
   0xc   :  { %v898_v1 = vld [vmem:[#allocation5 + $0x7c] sm:$0x10]  ;;  %v758_v4 = vld [vmem:[#allocation5 + $0x80] sm:$0x10]  ;;  %v764_v5 = vld [vmem:[#allocation5 + $0x8] sm:$0xf] }
   0xd   :  { %v757_v3 = vor.u32 %v898_v1, %v756_v0  ;;  %v899_v6 = vld [vmem:[#allocation5 + $0x84] sm:$0x10]  ;;  %v761_v7 = vor.u32 %v882_v2, %v758_v4  ;;  %v883_v9 = vld [vmem:[#allocation5 + $0xc] sm:$0xf]  ;;  %v46_v11 = vld [vmem:[#allocation2] sm:$0xff]  ;;  %s743_s27 = sshll.u32 %s1038_s3, 4  ;;  %s744_s27 = int_to_ptr.hbm [resolvable:$true] %s743_s27 }
   0xe   :  { %v765_v8 = vor.u32 %v899_v6, %v764_v5  ;;  %v766_v10 = vld [vmem:[#allocation5 + $0x88] sm:$0x10]  ;;  %87 = vst [vmem:[#allocation1] ss:$9 sm:$0xff] %v46_v11  ;;  %v780_v13 = vld [vmem:[#allocation5 + $0x18] sm:$0xf] }
   0xf   :  { %325 = vmatpush.bf16.xpose.msra.mxu0 %v757_v3  ;;  %v769_v12 = vor.u32 %v883_v9, %v766_v10  ;;  %v901_v14 = vld [vmem:[#allocation5 + $0x94] sm:$0x10]  ;;  %338 = vmatpush.bf16.xpose.msra.mxu1 %v761_v7  ;;  %v885_v16 = vld [vmem:[#allocation5 + $0x1c] sm:$0xf]  ;;  %v772_v18 = vld [vmem:[#allocation5 + $0x10] sm:$0xf] }
  0x10   :  { %351 = vmatpush.bf16.xpose.msra.mxu2 %v765_v8  ;;  %v781_v15 = vor.u32 %v901_v14, %v780_v13  ;;  %v782_v17 = vld [vmem:[#allocation5 + $0x98] sm:$0x10]  ;;  %v900_v20 = vld [vmem:[#allocation5 + $0x8c] sm:$0x10]  ;;  %v884_v21 = vld [vmem:[#allocation5 + $0x14] sm:$0xf] }
  0x11   :  { %364 = vmatpush.bf16.xpose.msra.mxu3 %v769_v12  ;;  %v785_v19 = vor.u32 %v885_v16, %v782_v17  ;;  %v774_v22 = vld [vmem:[#allocation5 + $0x90] sm:$0x10]  ;;  %v773_v23 = vor.u32 %v900_v20, %v772_v18  ;;  %v796_v25 = vld [vmem:[#allocation5 + $0x28] sm:$0xf]  ;;  %v887_v27 = vld [vmem:[#allocation5 + $0x2c] sm:$0xf] }
  0x12   :  { %v777_v24 = vor.u32 %v884_v21, %v774_v22  ;;  %v903_v26 = vld [vmem:[#allocation5 + $0xa4] sm:$0x10]  ;;  %v798_v28 = vld [vmem:[#allocation5 + $0xa8] sm:$0x10]  ;;  %v788_v29 = vld [vmem:[#allocation5 + $0x20] sm:$0xf] }
  0x13   :  { %v902_v30 = vld [vmem:[#allocation5 + $0x9c] sm:$0x10]  ;;  %v886_v31 = vld [vmem:[#allocation5 + $0x24] sm:$0xf]  ;;  %v47_v33 = vld [vmem:[#allocation2 + $0x8] sm:$0xff]  ;;  %v797_v34 = vor.u32 %v903_v26, %v796_v25  ;;  %v801_v35 = vor.u32 %v887_v27, %v798_v28  ;;  %vm734_vm0 = vcmask 74752  }
  0x14   :  { %v790_v32 = vld [vmem:[#allocation5 + $0xa0] sm:$0x10]  ;;  %v789_v39 = vor.u32 %v902_v30, %v788_v29  ;;  %v812_v46 = vld [vmem:[#allocation5 + $0x38] sm:$0xf]  ;;  %v889_v48 = vld [vmem:[#allocation5 + $0x3c] sm:$0xf] }
  0x15   :  { %v88_v36 = vld [vmem:[#allocation1] sm:$0xff]  ;;  %v89_v37 = vld [vmem:[#allocation1 + $0x9] sm:$0xff]  ;;  %v90_v38 = vld [vmem:[#allocation1 + $0x12] sm:$0xff]  ;;  %v793_v40 = vor.u32 %v886_v31, %v790_v32 }
  0x16   :  { %326 = vmatmul.bf16.vlgmr.msra.gmra.mxu0 %v88_v36  ;;  %339 = vmatmul.bf16.vlgmr.msra.gmra.mxu1 %v89_v37  ;;  %v91_v41 = vld [vmem:[#allocation1 + $0x1b] sm:$0xff]  ;;  %v92_v42 = vld [vmem:[#allocation1 + $0x24] sm:$0xff]  ;;  %v93_v43 = vld [vmem:[#allocation1 + $0x2d] sm:$0xff] }
  0x17   :  { %377 = vmatpush.bf16.xpose.msrb.mxu0 %v773_v23  ;;  %390 = vmatpush.bf16.xpose.msrb.mxu1 %v777_v24  ;;  %v94_v44 = vld [vmem:[#allocation1 + $0x36] sm:$0xff]  ;;  %v95_v45 = vld [vmem:[#allocation1 + $0x3f] sm:$0xff]  ;;  %v828_v3 = vld [vmem:[#allocation5 + $0x48] sm:$0xf] }
  0x18   :  { %403 = vmatpush.bf16.xpose.msrb.mxu2 %v781_v15  ;;  %365 = vmatmul.bf16.vlgmr.msra.gmra.mxu3 %v91_v41  ;;  %97 = vst [vmem:[#allocation1] ss:$9 sm:$0xff] %v47_v33  ;;  %v905_v47 = vld [vmem:[#allocation5 + $0xb4] sm:$0x10]  ;;  %v814_v49 = vld [vmem:[#allocation5 + $0xb8] sm:$0x10] }
  0x19   :  { %416 = vmatpush.bf16.xpose.msrb.mxu3 %v785_v19  ;;  %352 = vmatmul.bf16.vlgmr.msra.gmra.mxu2 %v90_v38  ;;  %v804_v50 = vld [vmem:[#allocation5 + $0x30] sm:$0xf]  ;;  %v888_v52 = vld [vmem:[#allocation5 + $0x34] sm:$0xf]  ;;  %v813_v54 = vor.u32 %v905_v47, %v812_v46  ;;  %v817_v55 = vor.u32 %v889_v48, %v814_v49  ;;  %v907_v4 = vld [vmem:[#allocation5 + $0xc4] sm:$0x10] }
  0x1a   :  { %v904_v51 = vld [vmem:[#allocation5 + $0xac] sm:$0x10]  ;;  %v806_v53 = vld [vmem:[#allocation5 + $0xb0] sm:$0x10]  ;;  %v891_v5 = vld [vmem:[#allocation5 + $0x4c] sm:$0xf]  ;;  %v829_v11 = vor.u32 %v907_v4, %v828_v3 }
  0x1b   :  { %v805_v56 = vor.u32 %v904_v51, %v804_v50  ;;  %v809_v57 = vor.u32 %v888_v52, %v806_v53  ;;  %v48_v2 = vld [vmem:[#allocation2 + $0x10] sm:$0xff]  ;;  %v830_v6 = vld [vmem:[#allocation5 + $0xc8] sm:$0x10]  ;;  %v820_v7 = vld [vmem:[#allocation5 + $0x40] sm:$0xf] }
  0x1c   :  { %v906_v8 = vld [vmem:[#allocation5 + $0xbc] sm:$0x10]  ;;  %v890_v9 = vld [vmem:[#allocation5 + $0x44] sm:$0xf]  ;;  %v833_v12 = vor.u32 %v891_v5, %v830_v6  ;;  %v844_v15 = vld [vmem:[#allocation5 + $0x58] sm:$0xf] }
  0x1d   :  { %v822_v10 = vld [vmem:[#allocation5 + $0xc0] sm:$0x10]  ;;  %v821_v13 = vor.u32 %v906_v8, %v820_v7  ;;  %v909_v16 = vld [vmem:[#allocation5 + $0xd4] sm:$0x10]  ;;  %v893_v17 = vld [vmem:[#allocation5 + $0x5c] sm:$0xf] }
  0x1e   :  { %v825_v14 = vor.u32 %v890_v9, %v822_v10  ;;  %v846_v18 = vld [vmem:[#allocation5 + $0xd8] sm:$0x10]  ;;  %v836_v19 = vld [vmem:[#allocation5 + $0x50] sm:$0xf]  ;;  %v892_v21 = vld [vmem:[#allocation5 + $0x54] sm:$0xf]  ;;  %v845_v23 = vor.u32 %v909_v16, %v844_v15 }
  0x1f   :  { %429 = vmatpush.bf16.xpose.msra.mxu0 %v789_v39  ;;  %442 = vmatpush.bf16.xpose.msra.mxu1 %v793_v40  ;;  %v98_v58 = vld [vmem:[#allocation1] sm:$0xff]  ;;  %v99_v59 = vld [vmem:[#allocation1 + $0x9] sm:$0xff]  ;;  %v100_v60 = vld [vmem:[#allocation1 + $0x12] sm:$0xff]  ;;  %v849_v24 = vor.u32 %v893_v17, %v846_v18 }
  0x20   :  { %455 = vmatpush.bf16.xpose.msra.mxu2 %v797_v34  ;;  %v101_v61 = vld [vmem:[#allocation1 + $0x1b] sm:$0xff]  ;;  %v102_v62 = vld [vmem:[#allocation1 + $0x24] sm:$0xff]  ;;  %v103_v63 = vld [vmem:[#allocation1 + $0x2d] sm:$0xff] }
  0x21   :  { %468 = vmatpush.bf16.xpose.msra.mxu3 %v801_v35  ;;  %v104_v0 = vld [vmem:[#allocation1 + $0x36] sm:$0xff]  ;;  %v105_v1 = vld [vmem:[#allocation1 + $0x3f] sm:$0xff]  ;;  %v860_v36 = vld [vmem:[#allocation5 + $0x68] sm:$0xf] }
  0x22   :  { %107 = vst [vmem:[#allocation1] ss:$9 sm:$0xff] %v48_v2  ;;  %v908_v20 = vld [vmem:[#allocation5 + $0xcc] sm:$0x10]  ;;  %v838_v22 = vld [vmem:[#allocation5 + $0xd0] sm:$0x10] }
  0x23   :  { %v837_v25 = vor.u32 %v908_v20, %v836_v19  ;;  %v841_v26 = vor.u32 %v892_v21, %v838_v22  ;;  %v49_v35 = vld [vmem:[#allocation2 + $0x18] sm:$0xff]  ;;  %v911_v37 = vld [vmem:[#allocation5 + $0xe4] sm:$0x10]  ;;  %v895_v38 = vld [vmem:[#allocation5 + $0x6c] sm:$0xf] }
  0x24   :  { %v862_v39 = vld [vmem:[#allocation5 + $0xe8] sm:$0x10]  ;;  %v852_v40 = vld [vmem:[#allocation5 + $0x60] sm:$0xf]  ;;  %v876_v48 = vld [vmem:[#allocation5 + $0x78] sm:$0xf] }
  0x25   :  { %v910_v41 = vld [vmem:[#allocation5 + $0xdc] sm:$0x10]  ;;  %v913_v49 = vld [vmem:[#allocation5 + $0xf4] sm:$0x10]  ;;  %v897_v50 = vld [vmem:[#allocation5 + $0x7c] sm:$0xf] }
  0x26   :  { %378 = vmatmul.bf16.vlgmr.msrb.gmra.mxu0 %v92_v42  ;;  %391 = vmatmul.bf16.vlgmr.msrb.gmra.mxu1 %v93_v43  ;;  %v894_v42 = vld [vmem:[#allocation5 + $0x64] sm:$0xf]  ;;  %v853_v46 = vor.u32 %v910_v41, %v852_v40  ;;  %v878_v51 = vld [vmem:[#allocation5 + $0xf8] sm:$0x10]  ;;  %v868_v52 = vld [vmem:[#allocation5 + $0x70] sm:$0xf] }
  0x27   :  { %481 = vmatpush.bf16.xpose.msrb.mxu0 %v805_v56  ;;  %494 = vmatpush.bf16.xpose.msrb.mxu1 %v809_v57  ;;  %v854_v43 = vld [vmem:[#allocation5 + $0xe0] sm:$0x10]  ;;  %v912_v53 = vld [vmem:[#allocation5 + $0xec] sm:$0x10]  ;;  %v877_v56 = vor.u32 %v913_v49, %v876_v48  ;;  %v881_v57 = vor.u32 %v897_v50, %v878_v51  ;;  %v919_v16 = vld [vmem:[%s1037_s2] ss:$0 sm:$0xff] }
  0x28   :  { %417 = vmatmul.bf16.vlgmr.msrb.gmra.mxu3 %v95_v45  ;;  %v865_v45 = vor.u32 %v895_v38, %v862_v39  ;;  %v857_v47 = vor.u32 %v894_v42, %v854_v43  ;;  %s1002_s2 = smov [#allocation7]  }
  0x29   :  { %404 = vmatmul.bf16.vlgmr.msrb.gmra.mxu2 %v94_v44  ;;  %520 = vmatpush.bf16.xpose.msrb.mxu3 %v817_v55  ;;  %v108_v27 = vld [vmem:[#allocation1] sm:$0xff]  ;;  %v109_v28 = vld [vmem:[#allocation1 + $0x9] sm:$0xff]  ;;  %v110_v29 = vld [vmem:[#allocation1 + $0x12] sm:$0xff]  ;;  %v861_v44 = vor.u32 %v911_v37, %v860_v36  ;;  %s741_s24 = sshll.u32 %s1002_s2, 4  ;;  %s742_s24 = int_to_ptr.vmem [resolvable:$true] %s741_s24 }
  0x2a   :  { %507 = vmatpush.bf16.xpose.msrb.mxu2 %v813_v54  ;;  %v111_v30 = vld [vmem:[#allocation1 + $0x1b] sm:$0xff]  ;;  %v112_v31 = vld [vmem:[#allocation1 + $0x24] sm:$0xff]  ;;  %v113_v32 = vld [vmem:[#allocation1 + $0x2d] sm:$0xff] }
  0x2b   :  { %v114_v33 = vld [vmem:[#allocation1 + $0x36] sm:$0xff]  ;;  %v115_v34 = vld [vmem:[#allocation1 + $0x3f] sm:$0xff] }
  0x2c   :  { %117 = vst [vmem:[#allocation1] ss:$9 sm:$0xff] %v49_v35  ;;  %v896_v54 = vld [vmem:[#allocation5 + $0x74] sm:$0xf] }
  0x2d   :  { %v870_v55 = vld [vmem:[#allocation5 + $0xf0] sm:$0x10] }
  0x33   :  { %v124_v2 = vld [vmem:[#allocation1 + $0x36] sm:$0xff]  ;;  %v125_v3 = vld [vmem:[#allocation1 + $0x3f] sm:$0xff] }
  0x36   :  { %430 = vmatmul.bf16.vlgmr.msra.gmra.mxu0 %v98_v58  ;;  %443 = vmatmul.bf16.vlgmr.msra.gmra.mxu1 %v99_v59  ;;  %v869_v58 = vor.u32 %v912_v53, %v868_v52  ;;  %v873_v59 = vor.u32 %v896_v54, %v870_v55 }
  0x37   :  { %533 = vmatpush.bf16.xpose.msra.mxu0 %v821_v13  ;;  %546 = vmatpush.bf16.xpose.msra.mxu1 %v825_v14 }
  0x38   :  { %469 = vmatmul.bf16.vlgmr.msra.gmra.mxu3 %v101_v61  ;;  %v119_v61 = vld [vmem:[#allocation1 + $0x9] sm:$0xff] }
  0x39   :  { %456 = vmatmul.bf16.vlgmr.msra.gmra.mxu2 %v100_v60  ;;  %572 = vmatpush.bf16.xpose.msra.mxu3 %v833_v12  ;;  %v118_v60 = vld [vmem:[#allocation1] sm:$0xff] }
  0x3a   :  { %559 = vmatpush.bf16.xpose.msra.mxu2 %v829_v11 }
  0x46   :  { %482 = vmatmul.bf16.vlgmr.msrb.gmra.mxu0 %v102_v62  ;;  %495 = vmatmul.bf16.vlgmr.msrb.gmra.mxu1 %v103_v63  ;;  %v120_v62 = vld [vmem:[#allocation1 + $0x12] sm:$0xff]  ;;  %v121_v63 = vld [vmem:[#allocation1 + $0x1b] sm:$0xff] }
  0x47   :  { %585 = vmatpush.bf16.xpose.msrb.mxu0 %v837_v25  ;;  %598 = vmatpush.bf16.xpose.msrb.mxu1 %v841_v26 }
  0x48   :  { %521 = vmatmul.bf16.vlgmr.msrb.gmra.mxu3 %v105_v1  ;;  %v123_v1 = vld [vmem:[#allocation1 + $0x2d] sm:$0xff] }
  0x49   :  { %508 = vmatmul.bf16.vlgmr.msrb.gmra.mxu2 %v104_v0  ;;  %624 = vmatpush.bf16.xpose.msrb.mxu3 %v849_v24  ;;  %v122_v0 = vld [vmem:[#allocation1 + $0x24] sm:$0xff] }
  0x4a   :  { %611 = vmatpush.bf16.xpose.msrb.mxu2 %v845_v23 }
  0x56   :  { %534 = vmatmul.bf16.vlgmr.msra.gmra.mxu0 %v108_v27  ;;  %547 = vmatmul.bf16.vlgmr.msra.gmra.mxu1 %v109_v28 }
  0x57   :  { %637 = vmatpush.bf16.xpose.msra.mxu0 %v853_v46  ;;  %650 = vmatpush.bf16.xpose.msra.mxu1 %v857_v47 }
  0x58   :  { %573 = vmatmul.bf16.vlgmr.msra.gmra.mxu3 %v111_v30 }
  0x59   :  { %560 = vmatmul.bf16.vlgmr.msra.gmra.mxu2 %v110_v29  ;;  %676 = vmatpush.bf16.xpose.msra.mxu3 %v865_v45 }
  0x5a   :  { %663 = vmatpush.bf16.xpose.msra.mxu2 %v861_v44 }
  0x66   :  { %586 = vmatmul.bf16.vlgmr.msrb.gmra.mxu0 %v112_v31  ;;  %599 = vmatmul.bf16.vlgmr.msrb.gmra.mxu1 %v113_v32 }
  0x67   :  { %689 = vmatpush.bf16.xpose.msrb.mxu0 %v869_v58  ;;  %702 = vmatpush.bf16.xpose.msrb.mxu1 %v873_v59 }
  0x68   :  { %625 = vmatmul.bf16.vlgmr.msrb.gmra.mxu3 %v115_v34 }
  0x69   :  { %612 = vmatmul.bf16.vlgmr.msrb.gmra.mxu2 %v114_v33  ;;  %728 = vmatpush.bf16.xpose.msrb.mxu3 %v881_v57 }
  0x6a   :  { %715 = vmatpush.bf16.xpose.msrb.mxu2 %v877_v56 }
  0x76   :  { %638 = vmatmul.bf16.vlgmr.msra.gmra.mxu0 %v118_v60  ;;  %651 = vmatmul.bf16.vlgmr.msra.gmra.mxu1 %v119_v61 }
  0x78   :  { %677 = vmatmul.bf16.vlgmr.msra.gmra.mxu3 %v121_v63 }
  0x79   :  { %664 = vmatmul.bf16.vlgmr.msra.gmra.mxu2 %v120_v62 }
  0x86   :  { %690 = vmatmul.bf16.vlgmr.msrb.gmra.mxu0 %v122_v0  ;;  %703 = vmatmul.bf16.vlgmr.msrb.gmra.mxu1 %v123_v1 }
  0x88   :  { %729 = vmatmul.bf16.vlgmr.msrb.gmra.mxu3 %v125_v3 }
  0x89   :  { %716 = vmatmul.bf16.vlgmr.msrb.gmra.mxu2 %v124_v2 }
  0x93   :  { %v327_v4 = vpop.f32.mrf.mxu0  ;;  %v340_v5 = vpop.f32.mrf.mxu1 }
  0x94   :  { %v328_v19 = vadd.f32 %v919_v16, %v327_v4 }
  0x96   :  { %v341_v22 = vadd.f32 %v340_v5, %v328_v19 }
  0x9b   :  { %v366_v7 = vpop.f32.mrf.mxu3  ;;  %v329_v8 = vpop.f32.mrf.mxu0 }
  0x9c   :  { %v353_v6 = vpop.f32.mrf.mxu2  ;;  %v342_v9 = vpop.f32.mrf.mxu1 }
  0x9d   :  { %v354_v25 = vadd.f32 %v353_v6, %v341_v22 }
  0x9f   :  { %v367_v28 = vadd.f32 %v366_v7, %v354_v25 }
  0xa3   :  { %v368_v11 = vpop.f32.mrf.mxu3  ;;  %v379_v12 = vpop.f32.mrf.mxu0 }
  0xa4   :  { %v355_v10 = vpop.f32.mrf.mxu2  ;;  %v392_v13 = vpop.f32.mrf.mxu1  ;;  %v380_v31 = vadd.f32 %v379_v12, %v367_v28 }
  0xa6   :  { %v393_v32 = vadd.f32 %v392_v13, %v380_v31 }
  0xab   :  { %v418_v15 = vpop.f32.mrf.mxu3  ;;  %v381_v17 = vpop.f32.mrf.mxu0 }
  0xac   :  { %v405_v14 = vpop.f32.mrf.mxu2  ;;  %v394_v18 = vpop.f32.mrf.mxu1 }
  0xad   :  { %v406_v35 = vadd.f32 %v405_v14, %v393_v32 }
  0xaf   :  { %v419_v38 = vadd.f32 %v418_v15, %v406_v35 }
  0xb3   :  { %v420_v21 = vpop.f32.mrf.mxu3  ;;  %v431_v23 = vpop.f32.mrf.mxu0 }
  0xb4   :  { %v407_v20 = vpop.f32.mrf.mxu2  ;;  %v444_v24 = vpop.f32.mrf.mxu1  ;;  %v432_v39 = vadd.f32 %v431_v23, %v419_v38 }
  0xb6   :  { %v445_v44 = vadd.f32 %v444_v24, %v432_v39 }
  0xbb   :  { %v470_v27 = vpop.f32.mrf.mxu3  ;;  %v433_v29 = vpop.f32.mrf.mxu0 }
  0xbc   :  { %v457_v26 = vpop.f32.mrf.mxu2  ;;  %v446_v30 = vpop.f32.mrf.mxu1 }
  0xbd   :  { %v458_v45 = vadd.f32 %v457_v26, %v445_v44 }
  0xbf   :  { %v471_v48 = vadd.f32 %v470_v27, %v458_v45 }
  0xc3   :  { %v472_v34 = vpop.f32.mrf.mxu3  ;;  %v483_v36 = vpop.f32.mrf.mxu0 }
  0xc4   :  { %v459_v33 = vpop.f32.mrf.mxu2  ;;  %v496_v37 = vpop.f32.mrf.mxu1  ;;  %v484_v51 = vadd.f32 %v483_v36, %v471_v48 }
  0xc6   :  { %v497_v52 = vadd.f32 %v496_v37, %v484_v51 }
  0xcb   :  { %v522_v41 = vpop.f32.mrf.mxu3  ;;  %v485_v42 = vpop.f32.mrf.mxu0 }
  0xcc   :  { %v509_v40 = vpop.f32.mrf.mxu2  ;;  %v498_v43 = vpop.f32.mrf.mxu1 }
  0xcd   :  { %v510_v55 = vadd.f32 %v509_v40, %v497_v52 }
  0xcf   :  { %v523_v58 = vadd.f32 %v522_v41, %v510_v55 }
  0xd3   :  { %v524_v47 = vpop.f32.mrf.mxu3  ;;  %v535_v49 = vpop.f32.mrf.mxu0 }
  0xd4   :  { %v511_v46 = vpop.f32.mrf.mxu2  ;;  %v548_v50 = vpop.f32.mrf.mxu1  ;;  %v536_v59 = vadd.f32 %v535_v49, %v523_v58 }
  0xd6   :  { %v549_v0 = vadd.f32 %v548_v50, %v536_v59 }
  0xdb   :  { %v574_v54 = vpop.f32.mrf.mxu3  ;;  %v537_v56 = vpop.f32.mrf.mxu0 }
  0xdc   :  { %v561_v53 = vpop.f32.mrf.mxu2  ;;  %v550_v57 = vpop.f32.mrf.mxu1 }
  0xdd   :  { %v562_v1 = vadd.f32 %v561_v53, %v549_v0 }
  0xdf   :  { %v575_v4 = vadd.f32 %v574_v54, %v562_v1 }
  0xe3   :  { %v576_v61 = vpop.f32.mrf.mxu3  ;;  %v587_v62 = vpop.f32.mrf.mxu0 }
  0xe4   :  { %v563_v60 = vpop.f32.mrf.mxu2  ;;  %v600_v63 = vpop.f32.mrf.mxu1  ;;  %v588_v7 = vadd.f32 %v587_v62, %v575_v4 }
  0xe6   :  { %v601_v8 = vadd.f32 %v600_v63, %v588_v7 }
  0xeb   :  { %v626_v3 = vpop.f32.mrf.mxu3  ;;  %v589_v5 = vpop.f32.mrf.mxu0 }
  0xec   :  { %v613_v2 = vpop.f32.mrf.mxu2  ;;  %v602_v6 = vpop.f32.mrf.mxu1 }
  0xed   :  { %v614_v11 = vadd.f32 %v613_v2, %v601_v8 }
  0xef   :  { %v627_v14 = vadd.f32 %v626_v3, %v614_v11 }
  0xf3   :  { %v628_v10 = vpop.f32.mrf.mxu3  ;;  %v639_v12 = vpop.f32.mrf.mxu0 }
  0xf4   :  { %v615_v9 = vpop.f32.mrf.mxu2  ;;  %v652_v13 = vpop.f32.mrf.mxu1  ;;  %v640_v15 = vadd.f32 %v639_v12, %v627_v14 }
  0xf6   :  { %v653_v20 = vadd.f32 %v652_v13, %v640_v15 }
  0xfb   :  { %v678_v17 = vpop.f32.mrf.mxu3  ;;  %v641_v18 = vpop.f32.mrf.mxu0 }
  0xfc   :  { %v665_v16 = vpop.f32.mrf.mxu2  ;;  %v654_v19 = vpop.f32.mrf.mxu1 }
  0xfd   :  { %v666_v21 = vadd.f32 %v665_v16, %v653_v20 }
  0xff   :  { %v679_v24 = vadd.f32 %v678_v17, %v666_v21 }
 0x103   :  { %v680_v23 = vpop.f32.mrf.mxu3  ;;  %v691_v25 = vpop.f32.mrf.mxu0 }
 0x104   :  { %v667_v22 = vpop.f32.mrf.mxu2  ;;  %v704_v26 = vpop.f32.mrf.mxu1  ;;  %v692_v27 = vadd.f32 %v691_v25, %v679_v24 }
 0x106   :  { %v705_v28 = vadd.f32 %v704_v26, %v692_v27 }
 0x10b   :  { %v730_v30 = vpop.f32.mrf.mxu3  ;;  %v693_v32 = vpop.f32.mrf.mxu0 }
 0x10c   :  { %v717_v29 = vpop.f32.mrf.mxu2  ;;  %v706_v33 = vpop.f32.mrf.mxu1 }
 0x10d   :  { %v718_v31 = vadd.f32 %v717_v29, %v705_v28 }
 0x10f   :  { %v731_v34 = vadd.f32 %v730_v30, %v718_v31 }
 0x111   :  { %735 = vst.msk [vmem:[#allocation7] sm:$0x3] %vm734_vm0, %v731_v34 }
 0x112   :  { %746 = dma.vmem_to_hbm [thread:$0]  %s742_s24, 32, %s744_s27, [#allocation4]  }
 0x113   :  { %v732_v36 = vpop.f32.mrf.mxu3 }
 0x114   :  { %v719_v35 = vpop.f32.mrf.mxu2 }
 0x115   :  { %996 = dma.done.wait [#allocation4], 32  }
 0x116   :  { %997 = vsyncadd [#allocation4], 4294967264 }
 0x117   :  { %751 = vsyncpa [#allocation3], 1 }
 0x118   :  { %752 = vsyncpa [#allocation6], 1 }
 0x119   :  { %753 = vsyncpa [#allocation4], 1 }

</bundles_post_ra>
